<compile_context>
chip_gen: v5e
topology: v5e:2x2
jax: 0.10.0
libtpu: 0.0.40
codegen_flags: <defaults>
</compile_context>

<pallas_src>
import numpy as np
import jax
import jax.numpy as jnp
from jax.experimental import pallas as pl
from jax.experimental.pallas import tpu as pltpu


LANE = 128        # TPU lane width; feature dims are zero-padded to this (lane-dense vst)
_ROW_TILE = 512   # row tile for the large-BH gridded path


# ----------------------------------------------------------------------------- #
# Schedule (plain numpy setup, identical math to the torch module)
# ----------------------------------------------------------------------------- #
def cosine_beta_schedule(timesteps, s=0.008):
    steps = timesteps + 1
    x = np.linspace(0, steps, steps)
    alphas_cumprod = np.cos(((x / steps) + s) / (1 + s) * np.pi * 0.5) ** 2
    alphas_cumprod = alphas_cumprod / alphas_cumprod[0]
    betas = 1.0 - (alphas_cumprod[1:] / alphas_cumprod[:-1])
    return np.clip(betas, 0.0, 0.999).astype(np.float64)


# ----------------------------------------------------------------------------- #
# Fused Pallas kernel: initial projection + all T DDIM steps + per-step projection
# ----------------------------------------------------------------------------- #
def _make_fused_ddim_kernel(a_coefs, c_coefs):
    """a_coefs / c_coefs: Python floats (one per executed step), baked as immediates."""
    T = len(a_coefs)

    def kernel(x0_ref, keep_ref, cval_ref, w1_ref, bias_ref, w2_ref, out_ref):
        keep = keep_ref[...]                 # (M, LANE) f32
        cval = cval_ref[...]                 # (M, LANE) f32
        w1 = w1_ref[...]                     # (LANE, LANE) bf16, zero-padded (D, HID)
        w2 = w2_ref[...]                     # (LANE, LANE) bf16, zero-padded (HID, D)
        bias_all = bias_ref[...]             # (2T, LANE) f32: [0:T]=temb@Wt+b1, [T:2T]=a_s*b2

        # initial condition projection applied to the noise
        x = x0_ref[...] * keep + cval

        # statically unrolled DDIM loop; weights/bias stay vreg/VMEM-resident throughout
        for s in range(T):
            b1row = bias_all[s:s + 1, :]             # (1, LANE) static slice (no ref load)
            b2row = bias_all[T + s:T + s + 1, :]     # (1, LANE) already scaled by a_s
            h = jnp.tanh(
                jnp.dot(x.astype(jnp.bfloat16), w1,
                        preferred_element_type=jnp.float32) + b1row)
            xr = jnp.dot(h.astype(jnp.bfloat16), w2,
                         preferred_element_type=jnp.float32)
            # NOTE: the torch reference calls x_recon.clamp(-1, 1) NOT in-place -> it is a
            # no-op; that (buggy but real) behaviour is reproduced here by not clamping.
            x = a_coefs[s] * xr + b2row + c_coefs[s] * x     # folded DDIM update (sigma = 0)
            x = x * keep + cval                              # condition projection
        out_ref[...] = x

    return kernel


# ----------------------------------------------------------------------------- #
class GaussianDiffusionPallas:
    """JAX/Pallas port of GaussianDiffusion.forward (== p_sample_loop with DDIM)."""

    def __init__(self, horizon, observation_dim, action_dim, class_dim,
                 n_diffusion_steps, hidden_dim=64, temb_dim=32, seed=42):
        self.horizon = horizon
        self.observation_dim = observation_dim
        self.action_dim = action_dim
        self.class_dim = class_dim
        self.transition_dim = class_dim + action_dim + observation_dim
        self.n_timesteps = n_diffusion_steps
        self.hidden_dim = hidden_dim
        self.temb_dim = temb_dim
        self.eta = 0.0
        self.random_ratio = 1.0
        self.clip_denoised = True

        assert self.transition_dim <= LANE and hidden_dim <= LANE

        betas = cosine_beta_schedule(self.n_timesteps)
        alphas = 1.0 - betas
        alphas_cumprod = np.cumprod(alphas)
        alphas_cumprod_prev = np.concatenate([[1.0], alphas_cumprod[:-1]])
        self.alphas_cumprod = alphas_cumprod
        self.alphas_cumprod_prev = alphas_cumprod_prev

        self.ddim_timesteps = 10
        c = self.n_timesteps // self.ddim_timesteps
        self.ddim_timestep_seq = np.asarray(list(range(0, self.n_timesteps, c)))

        # Deterministic synthetic denoiser parameters (stand-in for `self.model`):
        #   x_recon = tanh(x @ W1 + temb @ Wt + b1) @ W2 + b2
        # TODO(synk): the real denoiser is an external nn.Module not given in the spec.
        D, HID, E = self.transition_dim, hidden_dim, temb_dim
        k1, k2, k3 = jax.random.split(jax.random.PRNGKey(seed), 3)
        w1 = (jax.random.normal(k1, (D, HID)) / np.sqrt(D)).astype(jnp.float32)
        wt = (jax.random.normal(k2, (E, HID)) / np.sqrt(E)).astype(jnp.float32)
        b1 = jnp.zeros((1, HID), jnp.float32)
        w2 = (jax.random.normal(k3, (HID, D)) / np.sqrt(HID)).astype(jnp.float32)
        b2 = jnp.zeros((1, D), jnp.float32)

        # -------- host-side precompute (done once; none of this is in the hot path) ----
        # Zero-padded, bf16 weights -> lane-dense 128x128 single-pass MXU operands.
        # Padding is safe: padded x/h columns provably stay exactly 0 through every step.
        self.w1p = (jnp.zeros((LANE, LANE), jnp.float32)
                    .at[:D, :HID].set(w1).astype(jnp.bfloat16))
        self.w2p = (jnp.zeros((LANE, LANE), jnp.float32)
                    .at[:HID, :D].set(w2).astype(jnp.bfloat16))

        # Per-step (execution order) folded DDIM coefficients, computed in float64:
        #   x' = a_s * x_recon + c_s * x     (eta == 0  =>  sigma == 0, noise term == 0)
        T = self.ddim_timesteps
        seq = self.ddim_timestep_seq
        a_list, c_list, t_exec = [], [], []
        for s in range(T):
            i = T - 1 - s                                   # reversed(range(T))
            t = int(seq[i])
            t_exec.append(t)
            ab = float(alphas_cumprod[t])
            if i == 0:                                      # if_prev=True path: ac_prev[0]==1
                ab_prev = float(alphas_cumprod_prev[0])
            else:
                ab_prev = float(alphas_cumprod[int(seq[i - 1])])
            sigma = self.eta * np.sqrt((1.0 - ab_prev) / (1.0 - ab)) \
                             * np.sqrt(1.0 - ab / ab_prev)
            sqrt_recip = np.sqrt(1.0 / ab)
            sqrt_recipm1 = np.sqrt(1.0 / ab - 1.0)
            c_dir = np.sqrt(1.0 - ab_prev - sigma ** 2)
            a_list.append(float(np.sqrt(ab_prev) - c_dir / sqrt_recipm1))
            c_list.append(float(c_dir * sqrt_recip / sqrt_recipm1))
        self._a_coefs, self._c_coefs = a_list, c_list

        # Per-step bias table (2T, LANE):
        #   rows [0:T]  = temb(t_s) @ Wt + b1   (identical for every batch row)
        #   rows [T:2T] = a_s * b2              (b2 folded through the DDIM scale)
        ts = jnp.asarray(t_exec, jnp.float32)
        half = E // 2
        freqs = jnp.exp(-jnp.log(10000.0) * jnp.arange(half, dtype=jnp.float32) / half)
        args = ts[:, None] * freqs[None, :]
        temb = jnp.concatenate([jnp.sin(args), jnp.cos(args)], axis=-1)   # (T, E)
        bias1 = temb @ wt + b1                                            # (T, HID)
        b2p = jnp.zeros((1, LANE), jnp.float32).at[:, :D].set(b2)
        a_col = jnp.asarray(a_list, jnp.float32)[:, None]
        tbl = jnp.zeros((2 * T, LANE), jnp.float32)
        tbl = tbl.at[:T, :HID].set(bias1)
        tbl = tbl.at[T:, :].set(a_col * b2p)
        self.bias_table = tbl

        self._kernel = _make_fused_ddim_kernel(self._a_coefs, self._c_coefs)
        self._call_cache = {}
        self._fwd_cache = {}

    # ------------------------------------------------------------------ #
    def _fused_call(self, BH):
        if BH in self._call_cache:
            return self._call_cache[BH]

        T = self.ddim_timesteps
        flops = 4 * T * BH * LANE * LANE                       # 2 dots/step, 2*M*K*N each
        bytes_accessed = (4 * BH * LANE * 4                    # x0p, keep, cval, out (f32)
                          + 2 * LANE * LANE * 2                # w1p, w2p (bf16)
                          + 2 * T * LANE * 4)                  # bias table (f32)
        cost = pl.CostEstimate(flops=flops, transcendentals=T * BH * LANE,
                               bytes_accessed=bytes_accessed)
        out_shape = jax.ShapeDtypeStruct((BH, LANE), jnp.float32)

        if BH >= 1024 and BH % _ROW_TILE == 0:
            # Large-batch path: 1-D parallel grid over rows; weights/bias stay resident.
            TM = _ROW_TILE
            row_spec = lambda: pl.BlockSpec((TM, LANE), lambda i: (i, 0))
            call = pl.pallas_call(
                self._kernel,
                out_shape=out_shape,
                grid_spec=pltpu.PrefetchScalarGridSpec(
                    num_scalar_prefetch=0,
                    grid=(BH // TM,),
                    in_specs=[row_spec(), row_spec(), row_spec(),
                              pl.BlockSpec((LANE, LANE), lambda i: (0, 0)),
                              pl.BlockSpec((2 * T, LANE), lambda i: (0, 0)),
                              pl.BlockSpec((LANE, LANE), lambda i: (0, 0))],
                    out_specs=row_spec()),
                input_output_aliases={0: 0},
                compiler_params=pltpu.CompilerParams(
                    dimension_semantics=("parallel",),
                    vmem_limit_bytes=64 << 20),
                cost_estimate=cost)
        else:
            # Small-batch path: grid-less, everything resident in VMEM, single dispatch.
            vmem = pl.BlockSpec(memory_space=pltpu.MemorySpace.VMEM)
            call = pl.pallas_call(
                self._kernel,
                out_shape=out_shape,
                in_specs=[vmem] * 6,
                out_specs=vmem,
                input_output_aliases={0: 0},
                cost_estimate=cost)

        self._call_cache[BH] = call
        return call

    # ------------------------------------------------------------------ #
    def _build_keep_np(self, B, cond_keys):
        # TODO(synk): exact `condition_projection` helper source not provided; using the
        # standard PDPP semantics: zero observation dims at intermediate horizon steps,
        # overwrite observation dims at conditioned timesteps.  Expressed as
        #   x_new = x * keep + condval   so it fuses into the in-kernel step loop.
        H, D = self.horizon, self.transition_dim
        start = self.class_dim + self.action_dim
        keep = np.ones((B * H, LANE), np.float32)
        zero_rows = set(range(1, H - 1)) | set(int(h) for h in cond_keys)
        for h in zero_rows:
            for b in range(B):
                keep[b * H + h, start:D] = 0.0
        return keep

    # ------------------------------------------------------------------ #
    def _get_forward_fn(self, B, cond_keys):
        """One cached jitted executable per (batch, cond-key structure)."""
        cache_key = (B, cond_keys)
        if cache_key in self._fwd_cache:
            return self._fwd_cache[cache_key]

        H, D = self.horizon, self.transition_dim
        BH = B * H
        obs_start = self.class_dim + self.action_dim
        obs_dim = self.observation_dim

        keep = jnp.asarray(self._build_keep_np(B, cond_keys))          # built once, cached
        rows = {h: np.arange(B) * H + int(h) for h in cond_keys}       # static row indices
        fused = self._fused_call(BH)
        w1p, w2p, bias_table = self.w1p, self.w2p, self.bias_table
        random_ratio = self.random_ratio

        def fwd(key, cond_vals):
            noise = jax.random.normal(key, (BH, D), jnp.float32) * random_ratio
            x0p = jnp.zeros((BH, LANE), jnp.float32).at[:, :D].set(noise)
            condval = jnp.zeros((BH, LANE), jnp.float32)
            for h, val in zip(cond_keys, cond_vals):
                condval = condval.at[rows[h], obs_start:obs_start + obs_dim].set(val)
            out_p = fused(x0p, keep, condval, w1p, bias_table, w2p)
            return out_p[:, :D].reshape(B, H, D)

        jitted = jax.jit(fwd)
        self._fwd_cache[cache_key] = jitted
        return jitted

    # ------------------------------------------------------------------ #
    def forward(self, cond, key, if_jump=True):
        # torch forward always calls p_sample_loop(cond, True) -> DDIM branch.
        # TODO(synk): compute_mask / ifMask / mask_iteration=='add' paths omitted
        # (args.ifMask=False in the reference config -> mask unused).
        cond_keys = tuple(sorted(int(k) for k in cond.keys()))
        B = int(cond[cond_keys[0]].shape[0])
        fwd = self._get_forward_fn(B, cond_keys)
        cond_vals = tuple(jnp.asarray(cond[k], jnp.float32) for k in cond_keys)
        return fwd(key, cond_vals)

    # ------------------------------------------------------------------ #
    def reference_forward(self, cond, key):
        """Pure-JAX (non-Pallas) reference of exactly the same math, for validation."""
        cond_keys = tuple(sorted(int(k) for k in cond.keys()))
        B = int(cond[cond_keys[0]].shape[0])
        H, D = self.horizon, self.transition_dim
        BH = B * H
        obs_start = self.class_dim + self.action_dim
        T = self.ddim_timesteps

        keep = jnp.asarray(self._build_keep_np(B, cond_keys))
        condval = jnp.zeros((BH, LANE), jnp.float32)
        for h in cond_keys:
            rows = np.arange(B) * H + h
            condval = condval.at[rows, obs_start:obs_start + self.observation_dim].set(
                jnp.asarray(cond[h], jnp.float32))

        noise = jax.random.normal(key, (BH, D), jnp.float32) * self.random_ratio
        x = jnp.zeros((BH, LANE), jnp.float32).at[:, :D].set(noise)
        x = x * keep + condval
        for s in range(T):
            b1row = self.bias_table[s:s + 1]
            b2row = self.bias_table[T + s:T + s + 1]
            hact = jnp.tanh(jnp.dot(x.astype(jnp.bfloat16), self.w1p,
                                    preferred_element_type=jnp.float32) + b1row)
            xr = jnp.dot(hact.astype(jnp.bfloat16), self.w2p,
                         preferred_element_type=jnp.float32)
            x = self._a_coefs[s] * xr + b2row + self._c_coefs[s] * x
            x = x * keep + condval
        return x[:, :D].reshape(B, H, D)


# ----------------------------------------------------------------------------- #
if __name__ == "__main__":
    B = 2
    horizon = 8
    class_dim, action_dim, observation_dim = 4, 4, 24
    n_diffusion_steps = 200
    D = class_dim + action_dim + observation_dim

    model = GaussianDiffusionPallas(horizon, observation_dim, action_dim, class_dim,
                                    n_diffusion_steps)

    key = jax.random.PRNGKey(0)
    k_c0, k_c1, k_noise = jax.random.split(key, 3)
    cond = {
        0: jax.random.normal(k_c0, (B, observation_dim), jnp.float32),            # start obs
        horizon - 1: jax.random.normal(k_c1, (B, observation_dim), jnp.float32),  # goal obs
    }

    # --- small-batch (grid-less, fully fused) path ----------------------------------
    out = jax.block_until_ready(model.forward(cond, k_noise, if_jump=True))
    assert out.shape == (B, horizon, D)
    assert bool(jnp.all(jnp.isfinite(out)))

    ref = jax.block_until_ready(model.reference_forward(cond, k_noise))
    assert np.allclose(np.asarray(out), np.asarray(ref), atol=1e-2, rtol=1e-2), (
        "max abs diff vs pure-JAX reference: "
        + str(float(np.max(np.abs(np.asarray(out) - np.asarray(ref))))))

    # Second call with the same cond structure reuses the cached jitted executable.
    out2 = jax.block_until_ready(model.forward(cond, jax.random.PRNGKey(7)))
    assert bool(jnp.all(jnp.isfinite(out2)))

    # --- large-batch (1-D parallel grid over rows) path ------------------------------
    B_big = 128                               # BH = 1024 -> tiled path (2 blocks of 512)
    kb0, kb1, kbn = jax.random.split(jax.random.PRNGKey(3), 3)
    cond_big = {
        0: jax.random.normal(kb0, (B_big, observation_dim), jnp.float32),
        horizon - 1: jax.random.normal(kb1, (B_big, observation_dim), jnp.float32),
    }
    out_big = jax.block_until_ready(model.forward(cond_big, kbn))
    assert out_big.shape == (B_big, horizon, D)
    assert bool(jnp.all(jnp.isfinite(out_big)))
    ref_big = jax.block_until_ready(model.reference_forward(cond_big, kbn))
    assert np.allclose(np.asarray(out_big), np.asarray(ref_big), atol=2e-2, rtol=2e-2)

    print("KERNEL_OK")
</pallas_src>

<mosaic_0001>
module attributes {stable_mosaic.version = 11 : i64} {
  func.func @kernel(%arg0: memref<16x128xf32, #tpu.memory_space<vmem>>, %arg1: memref<16x128xf32, #tpu.memory_space<vmem>>, %arg2: memref<16x128xf32, #tpu.memory_space<vmem>>, %arg3: memref<128x128xbf16, #tpu.memory_space<vmem>>, %arg4: memref<20x128xf32, #tpu.memory_space<vmem>>, %arg5: memref<128x128xbf16, #tpu.memory_space<vmem>>, %arg6: memref<16x128xf32, #tpu.memory_space<vmem>>) attributes {dimension_semantics = [], scalar_prefetch = 0 : i64, scratch_operands = 0 : i64, tpu.core_type = #tpu.core_type<tc>} {
    %c0 = arith.constant 0 : index
    %c0_0 = arith.constant 0 : index
    %0 = vector.load %arg1[%c0, %c0_0] : memref<16x128xf32, #tpu.memory_space<vmem>>, vector<16x128xf32>
    %c0_1 = arith.constant 0 : index
    %c0_2 = arith.constant 0 : index
    %1 = vector.load %arg2[%c0_1, %c0_2] : memref<16x128xf32, #tpu.memory_space<vmem>>, vector<16x128xf32>
    %c0_3 = arith.constant 0 : index
    %c0_4 = arith.constant 0 : index
    %2 = vector.load %arg3[%c0_3, %c0_4] : memref<128x128xbf16, #tpu.memory_space<vmem>>, vector<128x128xbf16>
    %c0_5 = arith.constant 0 : index
    %c0_6 = arith.constant 0 : index
    %3 = vector.load %arg5[%c0_5, %c0_6] : memref<128x128xbf16, #tpu.memory_space<vmem>>, vector<128x128xbf16>
    %c0_7 = arith.constant 0 : index
    %c0_8 = arith.constant 0 : index
    %4 = vector.load %arg4[%c0_7, %c0_8] : memref<20x128xf32, #tpu.memory_space<vmem>>, vector<20x128xf32>
    %c0_9 = arith.constant 0 : index
    %c0_10 = arith.constant 0 : index
    %5 = vector.load %arg0[%c0_9, %c0_10] : memref<16x128xf32, #tpu.memory_space<vmem>>, vector<16x128xf32>
    %6 = arith.mulf %5, %0 : vector<16x128xf32>
    %7 = arith.addf %6, %1 : vector<16x128xf32>
    %8 = vector.extract_strided_slice %4 {offsets = [0, 0], sizes = [1, 128], strides = [1, 1]} : vector<20x128xf32> to vector<1x128xf32>
    %9 = vector.extract_strided_slice %4 {offsets = [10, 0], sizes = [1, 128], strides = [1, 1]} : vector<20x128xf32> to vector<1x128xf32>
    %10 = arith.truncf %7 : vector<16x128xf32> to vector<16x128xbf16>
    %cst = arith.constant dense<0.000000e+00> : vector<16x128xf32>
    %11 = tpu.matmul %10, %2, %cst {dimension_numbers = #tpu.dot_dimension_numbers<[1], [0], [0], [1], [0, 0, 1, 1], [], []>} : vector<16x128xbf16>, vector<128x128xbf16>, vector<16x128xf32> -> vector<16x128xf32>
    %12 = vector.broadcast %8 : vector<1x128xf32> to vector<16x128xf32>
    %13 = arith.addf %11, %12 : vector<16x128xf32>
    %14 = math.tanh %13 : vector<16x128xf32>
    %15 = arith.truncf %14 : vector<16x128xf32> to vector<16x128xbf16>
    %cst_11 = arith.constant dense<0.000000e+00> : vector<16x128xf32>
    %16 = tpu.matmul %15, %3, %cst_11 {dimension_numbers = #tpu.dot_dimension_numbers<[1], [0], [0], [1], [0, 0, 1, 1], [], []>} : vector<16x128xbf16>, vector<128x128xbf16>, vector<16x128xf32> -> vector<16x128xf32>
    %cst_12 = arith.constant 0.156932473 : f32
    %17 = vector.broadcast %cst_12 : f32 to vector<16x128xf32>
    %18 = arith.mulf %17, %16 : vector<16x128xf32>
    %19 = vector.broadcast %9 : vector<1x128xf32> to vector<16x128xf32>
    %20 = arith.addf %18, %19 : vector<16x128xf32>
    %cst_13 = arith.constant 0.964731097 : f32
    %21 = vector.broadcast %cst_13 : f32 to vector<16x128xf32>
    %22 = arith.mulf %21, %7 : vector<16x128xf32>
    %23 = arith.addf %20, %22 : vector<16x128xf32>
    %24 = arith.mulf %23, %0 : vector<16x128xf32>
    %25 = arith.addf %24, %1 : vector<16x128xf32>
    %26 = vector.extract_strided_slice %4 {offsets = [1, 0], sizes = [1, 128], strides = [1, 1]} : vector<20x128xf32> to vector<1x128xf32>
    %27 = vector.extract_strided_slice %4 {offsets = [11, 0], sizes = [1, 128], strides = [1, 1]} : vector<20x128xf32> to vector<1x128xf32>
    %28 = arith.truncf %25 : vector<16x128xf32> to vector<16x128xbf16>
    %cst_14 = arith.constant dense<0.000000e+00> : vector<16x128xf32>
    %29 = tpu.matmul %28, %2, %cst_14 {dimension_numbers = #tpu.dot_dimension_numbers<[1], [0], [0], [1], [0, 0, 1, 1], [], []>} : vector<16x128xbf16>, vector<128x128xbf16>, vector<16x128xf32> -> vector<16x128xf32>
    %30 = vector.broadcast %26 : vector<1x128xf32> to vector<16x128xf32>
    %31 = arith.addf %29, %30 : vector<16x128xf32>
    %32 = math.tanh %31 : vector<16x128xf32>
    %33 = arith.truncf %32 : vector<16x128xf32> to vector<16x128xbf16>
    %cst_15 = arith.constant dense<0.000000e+00> : vector<16x128xf32>
    %34 = tpu.matmul %33, %3, %cst_15 {dimension_numbers = #tpu.dot_dimension_numbers<[1], [0], [0], [1], [0, 0, 1, 1], [], []>} : vector<16x128xbf16>, vector<128x128xbf16>, vector<16x128xf32> -> vector<16x128xf32>
    %cst_16 = arith.constant 0.162671015 : f32
    %35 = vector.broadcast %cst_16 : f32 to vector<16x128xf32>
    %36 = arith.mulf %35, %34 : vector<16x128xf32>
    %37 = vector.broadcast %27 : vector<1x128xf32> to vector<16x128xf32>
    %38 = arith.addf %36, %37 : vector<16x128xf32>
    %cst_17 = arith.constant 0.939202308 : f32
    %39 = vector.broadcast %cst_17 : f32 to vector<16x128xf32>
    %40 = arith.mulf %39, %25 : vector<16x128xf32>
    %41 = arith.addf %38, %40 : vector<16x128xf32>
    %42 = arith.mulf %41, %0 : vector<16x128xf32>
    %43 = arith.addf %42, %1 : vector<16x128xf32>
    %44 = vector.extract_strided_slice %4 {offsets = [2, 0], sizes = [1, 128], strides = [1, 1]} : vector<20x128xf32> to vector<1x128xf32>
    %45 = vector.extract_strided_slice %4 {offsets = [12, 0], sizes = [1, 128], strides = [1, 1]} : vector<20x128xf32> to vector<1x128xf32>
    %46 = arith.truncf %43 : vector<16x128xf32> to vector<16x128xbf16>
    %cst_18 = arith.constant dense<0.000000e+00> : vector<16x128xf32>
    %47 = tpu.matmul %46, %2, %cst_18 {dimension_numbers = #tpu.dot_dimension_numbers<[1], [0], [0], [1], [0, 0, 1, 1], [], []>} : vector<16x128xbf16>, vector<128x128xbf16>, vector<16x128xf32> -> vector<16x128xf32>
    %48 = vector.broadcast %44 : vector<1x128xf32> to vector<16x128xf32>
    %49 = arith.addf %47, %48 : vector<16x128xf32>
    %50 = math.tanh %49 : vector<16x128xf32>
    %51 = arith.truncf %50 : vector<16x128xf32> to vector<16x128xbf16>
    %cst_19 = arith.constant dense<0.000000e+00> : vector<16x128xf32>
    %52 = tpu.matmul %51, %3, %cst_19 {dimension_numbers = #tpu.dot_dimension_numbers<[1], [0], [0], [1], [0, 0, 1, 1], [], []>} : vector<16x128xbf16>, vector<128x128xbf16>, vector<16x128xf32> -> vector<16x128xf32>
    %cst_20 = arith.constant 0.173203871 : f32
    %53 = vector.broadcast %cst_20 : f32 to vector<16x128xf32>
    %54 = arith.mulf %53, %52 : vector<16x128xf32>
    %55 = vector.broadcast %45 : vector<1x128xf32> to vector<16x128xf32>
    %56 = arith.addf %54, %55 : vector<16x128xf32>
    %cst_21 = arith.constant 0.911025941 : f32
    %57 = vector.broadcast %cst_21 : f32 to vector<16x128xf32>
    %58 = arith.mulf %57, %43 : vector<16x128xf32>
    %59 = arith.addf %56, %58 : vector<16x128xf32>
    %60 = arith.mulf %59, %0 : vector<16x128xf32>
    %61 = arith.addf %60, %1 : vector<16x128xf32>
    %62 = vector.extract_strided_slice %4 {offsets = [3, 0], sizes = [1, 128], strides = [1, 1]} : vector<20x128xf32> to vector<1x128xf32>
    %63 = vector.extract_strided_slice %4 {offsets = [13, 0], sizes = [1, 128], strides = [1, 1]} : vector<20x128xf32> to vector<1x128xf32>
    %64 = arith.truncf %61 : vector<16x128xf32> to vector<16x128xbf16>
    %cst_22 = arith.constant dense<0.000000e+00> : vector<16x128xf32>
    %65 = tpu.matmul %64, %2, %cst_22 {dimension_numbers = #tpu.dot_dimension_numbers<[1], [0], [0], [1], [0, 0, 1, 1], [], []>} : vector<16x128xbf16>, vector<128x128xbf16>, vector<16x128xf32> -> vector<16x128xf32>
    %66 = vector.broadcast %62 : vector<1x128xf32> to vector<16x128xf32>
    %67 = arith.addf %65, %66 : vector<16x128xf32>
    %68 = math.tanh %67 : vector<16x128xf32>
    %69 = arith.truncf %68 : vector<16x128xf32> to vector<16x128xbf16>
    %cst_23 = arith.constant dense<0.000000e+00> : vector<16x128xf32>
    %70 = tpu.matmul %69, %3, %cst_23 {dimension_numbers = #tpu.dot_dimension_numbers<[1], [0], [0], [1], [0, 0, 1, 1], [], []>} : vector<16x128xbf16>, vector<128x128xbf16>, vector<16x128xf32> -> vector<16x128xf32>
    %cst_24 = arith.constant 0.190124571 : f32
    %71 = vector.broadcast %cst_24 : f32 to vector<16x128xf32>
    %72 = arith.mulf %71, %70 : vector<16x128xf32>
    %73 = vector.broadcast %63 : vector<1x128xf32> to vector<16x128xf32>
    %74 = arith.addf %72, %73 : vector<16x128xf32>
    %cst_25 = arith.constant 8.780930e-01 : f32
    %75 = vector.broadcast %cst_25 : f32 to vector<16x128xf32>
    %76 = arith.mulf %75, %61 : vector<16x128xf32>
    %77 = arith.addf %74, %76 : vector<16x128xf32>
    %78 = arith.mulf %77, %0 : vector<16x128xf32>
    %79 = arith.addf %78, %1 : vector<16x128xf32>
    %80 = vector.extract_strided_slice %4 {offsets = [4, 0], sizes = [1, 128], strides = [1, 1]} : vector<20x128xf32> to vector<1x128xf32>
    %81 = vector.extract_strided_slice %4 {offsets = [14, 0], sizes = [1, 128], strides = [1, 1]} : vector<20x128xf32> to vector<1x128xf32>
    %82 = arith.truncf %79 : vector<16x128xf32> to vector<16x128xbf16>
    %cst_26 = arith.constant dense<0.000000e+00> : vector<16x128xf32>
    %83 = tpu.matmul %82, %2, %cst_26 {dimension_numbers = #tpu.dot_dimension_numbers<[1], [0], [0], [1], [0, 0, 1, 1], [], []>} : vector<16x128xbf16>, vector<128x128xbf16>, vector<16x128xf32> -> vector<16x128xf32>
    %84 = vector.broadcast %80 : vector<1x128xf32> to vector<16x128xf32>
    %85 = arith.addf %83, %84 : vector<16x128xf32>
    %86 = math.tanh %85 : vector<16x128xf32>
    %87 = arith.truncf %86 : vector<16x128xf32> to vector<16x128xbf16>
    %cst_27 = arith.constant dense<0.000000e+00> : vector<16x128xf32>
    %88 = tpu.matmul %87, %3, %cst_27 {dimension_numbers = #tpu.dot_dimension_numbers<[1], [0], [0], [1], [0, 0, 1, 1], [], []>} : vector<16x128xbf16>, vector<128x128xbf16>, vector<16x128xf32> -> vector<16x128xf32>
    %cst_28 = arith.constant 0.2165301 : f32
    %89 = vector.broadcast %cst_28 : f32 to vector<16x128xf32>
    %90 = arith.mulf %89, %88 : vector<16x128xf32>
    %91 = vector.broadcast %81 : vector<1x128xf32> to vector<16x128xf32>
    %92 = arith.addf %90, %91 : vector<16x128xf32>
    %cst_29 = arith.constant 0.83691895 : f32
    %93 = vector.broadcast %cst_29 : f32 to vector<16x128xf32>
    %94 = arith.mulf %93, %79 : vector<16x128xf32>
    %95 = arith.addf %92, %94 : vector<16x128xf32>
    %96 = arith.mulf %95, %0 : vector<16x128xf32>
    %97 = arith.addf %96, %1 : vector<16x128xf32>
    %98 = vector.extract_strided_slice %4 {offsets = [5, 0], sizes = [1, 128], strides = [1, 1]} : vector<20x128xf32> to vector<1x128xf32>
    %99 = vector.extract_strided_slice %4 {offsets = [15, 0], sizes = [1, 128], strides = [1, 1]} : vector<20x128xf32> to vector<1x128xf32>
    %100 = arith.truncf %97 : vector<16x128xf32> to vector<16x128xbf16>
    %cst_30 = arith.constant dense<0.000000e+00> : vector<16x128xf32>
    %101 = tpu.matmul %100, %2, %cst_30 {dimension_numbers = #tpu.dot_dimension_numbers<[1], [0], [0], [1], [0, 0, 1, 1], [], []>} : vector<16x128xbf16>, vector<128x128xbf16>, vector<16x128xf32> -> vector<16x128xf32>
    %102 = vector.broadcast %98 : vector<1x128xf32> to vector<16x128xf32>
    %103 = arith.addf %101, %102 : vector<16x128xf32>
    %104 = math.tanh %103 : vector<16x128xf32>
    %105 = arith.truncf %104 : vector<16x128xf32> to vector<16x128xbf16>
    %cst_31 = arith.constant dense<0.000000e+00> : vector<16x128xf32>
    %106 = tpu.matmul %105, %3, %cst_31 {dimension_numbers = #tpu.dot_dimension_numbers<[1], [0], [0], [1], [0, 0, 1, 1], [], []>} : vector<16x128xbf16>, vector<128x128xbf16>, vector<16x128xf32> -> vector<16x128xf32>
    %cst_32 = arith.constant 0.258747369 : f32
    %107 = vector.broadcast %cst_32 : f32 to vector<16x128xf32>
    %108 = arith.mulf %107, %106 : vector<16x128xf32>
    %109 = vector.broadcast %99 : vector<1x128xf32> to vector<16x128xf32>
    %110 = arith.addf %108, %109 : vector<16x128xf32>
    %cst_33 = arith.constant 0.780875802 : f32
    %111 = vector.broadcast %cst_33 : f32 to vector<16x128xf32>
    %112 = arith.mulf %111, %97 : vector<16x128xf32>
    %113 = arith.addf %110, %112 : vector<16x128xf32>
    %114 = arith.mulf %113, %0 : vector<16x128xf32>
    %115 = arith.addf %114, %1 : vector<16x128xf32>
    %116 = vector.extract_strided_slice %4 {offsets = [6, 0], sizes = [1, 128], strides = [1, 1]} : vector<20x128xf32> to vector<1x128xf32>
    %117 = vector.extract_strided_slice %4 {offsets = [16, 0], sizes = [1, 128], strides = [1, 1]} : vector<20x128xf32> to vector<1x128xf32>
    %118 = arith.truncf %115 : vector<16x128xf32> to vector<16x128xbf16>
    %cst_34 = arith.constant dense<0.000000e+00> : vector<16x128xf32>
    %119 = tpu.matmul %118, %2, %cst_34 {dimension_numbers = #tpu.dot_dimension_numbers<[1], [0], [0], [1], [0, 0, 1, 1], [], []>} : vector<16x128xbf16>, vector<128x128xbf16>, vector<16x128xf32> -> vector<16x128xf32>
    %120 = vector.broadcast %116 : vector<1x128xf32> to vector<16x128xf32>
    %121 = arith.addf %119, %120 : vector<16x128xf32>
    %122 = math.tanh %121 : vector<16x128xf32>
    %123 = arith.truncf %122 : vector<16x128xf32> to vector<16x128xbf16>
    %cst_35 = arith.constant dense<0.000000e+00> : vector<16x128xf32>
    %124 = tpu.matmul %123, %3, %cst_35 {dimension_numbers = #tpu.dot_dimension_numbers<[1], [0], [0], [1], [0, 0, 1, 1], [], []>} : vector<16x128xbf16>, vector<128x128xbf16>, vector<16x128xf32> -> vector<16x128xf32>
    %cst_36 = arith.constant 0.331431538 : f32
    %125 = vector.broadcast %cst_36 : f32 to vector<16x128xf32>
    %126 = arith.mulf %125, %124 : vector<16x128xf32>
    %127 = vector.broadcast %117 : vector<1x128xf32> to vector<16x128xf32>
    %128 = arith.addf %126, %127 : vector<16x128xf32>
    %cst_37 = arith.constant 0.695065557 : f32
    %129 = vector.broadcast %cst_37 : f32 to vector<16x128xf32>
    %130 = arith.mulf %129, %115 : vector<16x128xf32>
    %131 = arith.addf %128, %130 : vector<16x128xf32>
    %132 = arith.mulf %131, %0 : vector<16x128xf32>
    %133 = arith.addf %132, %1 : vector<16x128xf32>
    %134 = vector.extract_strided_slice %4 {offsets = [7, 0], sizes = [1, 128], strides = [1, 1]} : vector<20x128xf32> to vector<1x128xf32>
    %135 = vector.extract_strided_slice %4 {offsets = [17, 0], sizes = [1, 128], strides = [1, 1]} : vector<20x128xf32> to vector<1x128xf32>
    %136 = arith.truncf %133 : vector<16x128xf32> to vector<16x128xbf16>
    %cst_38 = arith.constant dense<0.000000e+00> : vector<16x128xf32>
    %137 = tpu.matmul %136, %2, %cst_38 {dimension_numbers = #tpu.dot_dimension_numbers<[1], [0], [0], [1], [0, 0, 1, 1], [], []>} : vector<16x128xbf16>, vector<128x128xbf16>, vector<16x128xf32> -> vector<16x128xf32>
    %138 = vector.broadcast %134 : vector<1x128xf32> to vector<16x128xf32>
    %139 = arith.addf %137, %138 : vector<16x128xf32>
    %140 = math.tanh %139 : vector<16x128xf32>
    %141 = arith.truncf %140 : vector<16x128xf32> to vector<16x128xbf16>
    %cst_39 = arith.constant dense<0.000000e+00> : vector<16x128xf32>
    %142 = tpu.matmul %141, %3, %cst_39 {dimension_numbers = #tpu.dot_dimension_numbers<[1], [0], [0], [1], [0, 0, 1, 1], [], []>} : vector<16x128xbf16>, vector<128x128xbf16>, vector<16x128xf32> -> vector<16x128xf32>
    %cst_40 = arith.constant 0.477237552 : f32
    %143 = vector.broadcast %cst_40 : f32 to vector<16x128xf32>
    %144 = arith.mulf %143, %142 : vector<16x128xf32>
    %145 = vector.broadcast %135 : vector<1x128xf32> to vector<16x128xf32>
    %146 = arith.addf %144, %145 : vector<16x128xf32>
    %cst_41 = arith.constant 0.536626101 : f32
    %147 = vector.broadcast %cst_41 : f32 to vector<16x128xf32>
    %148 = arith.mulf %147, %133 : vector<16x128xf32>
    %149 = arith.addf %146, %148 : vector<16x128xf32>
    %150 = arith.mulf %149, %0 : vector<16x128xf32>
    %151 = arith.addf %150, %1 : vector<16x128xf32>
    %152 = vector.extract_strided_slice %4 {offsets = [8, 0], sizes = [1, 128], strides = [1, 1]} : vector<20x128xf32> to vector<1x128xf32>
    %153 = vector.extract_strided_slice %4 {offsets = [18, 0], sizes = [1, 128], strides = [1, 1]} : vector<20x128xf32> to vector<1x128xf32>
    %154 = arith.truncf %151 : vector<16x128xf32> to vector<16x128xbf16>
    %cst_42 = arith.constant dense<0.000000e+00> : vector<16x128xf32>
    %155 = tpu.matmul %154, %2, %cst_42 {dimension_numbers = #tpu.dot_dimension_numbers<[1], [0], [0], [1], [0, 0, 1, 1], [], []>} : vector<16x128xbf16>, vector<128x128xbf16>, vector<16x128xf32> -> vector<16x128xf32>
    %156 = vector.broadcast %152 : vector<1x128xf32> to vector<16x128xf32>
    %157 = arith.addf %155, %156 : vector<16x128xf32>
    %158 = math.tanh %157 : vector<16x128xf32>
    %159 = arith.truncf %158 : vector<16x128xf32> to vector<16x128xbf16>
    %cst_43 = arith.constant dense<0.000000e+00> : vector<16x128xf32>
    %160 = tpu.matmul %159, %3, %cst_43 {dimension_numbers = #tpu.dot_dimension_numbers<[1], [0], [0], [1], [0, 0, 1, 1], [], []>} : vector<16x128xbf16>, vector<128x128xbf16>, vector<16x128xf32> -> vector<16x128xf32>
    %cst_44 = arith.constant 0.909904122 : f32
    %161 = vector.broadcast %cst_44 : f32 to vector<16x128xf32>
    %162 = arith.mulf %161, %160 : vector<16x128xf32>
    %163 = vector.broadcast %153 : vector<1x128xf32> to vector<16x128xf32>
    %164 = arith.addf %162, %163 : vector<16x128xf32>
    %cst_45 = arith.constant 0.0913743824 : f32
    %165 = vector.broadcast %cst_45 : f32 to vector<16x128xf32>
    %166 = arith.mulf %165, %151 : vector<16x128xf32>
    %167 = arith.addf %164, %166 : vector<16x128xf32>
    %168 = arith.mulf %167, %0 : vector<16x128xf32>
    %169 = arith.addf %168, %1 : vector<16x128xf32>
    %170 = vector.extract_strided_slice %4 {offsets = [9, 0], sizes = [1, 128], strides = [1, 1]} : vector<20x128xf32> to vector<1x128xf32>
    %171 = vector.extract_strided_slice %4 {offsets = [19, 0], sizes = [1, 128], strides = [1, 1]} : vector<20x128xf32> to vector<1x128xf32>
    %172 = arith.truncf %169 : vector<16x128xf32> to vector<16x128xbf16>
    %cst_46 = arith.constant dense<0.000000e+00> : vector<16x128xf32>
    %173 = tpu.matmul %172, %2, %cst_46 {dimension_numbers = #tpu.dot_dimension_numbers<[1], [0], [0], [1], [0, 0, 1, 1], [], []>} : vector<16x128xbf16>, vector<128x128xbf16>, vector<16x128xf32> -> vector<16x128xf32>
    %174 = vector.broadcast %170 : vector<1x128xf32> to vector<16x128xf32>
    %175 = arith.addf %173, %174 : vector<16x128xf32>
    %176 = math.tanh %175 : vector<16x128xf32>
    %177 = arith.truncf %176 : vector<16x128xf32> to vector<16x128xbf16>
    %cst_47 = arith.constant dense<0.000000e+00> : vector<16x128xf32>
    %178 = tpu.matmul %177, %3, %cst_47 {dimension_numbers = #tpu.dot_dimension_numbers<[1], [0], [0], [1], [0, 0, 1, 1], [], []>} : vector<16x128xbf16>, vector<128x128xbf16>, vector<16x128xf32> -> vector<16x128xf32>
    %cst_48 = arith.constant 1.000000e+00 : f32
    %179 = vector.broadcast %cst_48 : f32 to vector<16x128xf32>
    %180 = arith.mulf %179, %178 : vector<16x128xf32>
    %181 = vector.broadcast %171 : vector<1x128xf32> to vector<16x128xf32>
    %182 = arith.addf %180, %181 : vector<16x128xf32>
    %cst_49 = arith.constant 0.000000e+00 : f32
    %183 = vector.broadcast %cst_49 : f32 to vector<16x128xf32>
    %184 = arith.mulf %183, %169 : vector<16x128xf32>
    %185 = arith.addf %182, %184 : vector<16x128xf32>
    %186 = arith.mulf %185, %0 : vector<16x128xf32>
    %187 = arith.addf %186, %1 : vector<16x128xf32>
    %c0_50 = arith.constant 0 : index
    %c0_51 = arith.constant 0 : index
    %188 = vector.load %arg6[%c0_50, %c0_51] : memref<16x128xf32, #tpu.memory_space<vmem>>, vector<16x128xf32>
    tpu.vector_store %arg6[%c0_50, %c0_51], %187 {strides = array<i32>} : memref<16x128xf32, #tpu.memory_space<vmem>>, vector<16x128xf32>,
    return
  }
}

</mosaic_0001>

<bundles_post_ra>
// kernel: fwd.1
= control target key start
LH: loop header
LB: loop body
LE: loop exit
PB: predicated region body
PF: predicated region fallthrough
CT: control target
= control target key end

     0   :  { %s1140_s3 = inlined_call_operand.vmem [shape: bf16[128,128], index: 3, kind: input, shape index: {}]   ;;  %s1141_s5 = inlined_call_operand.vmem [shape: bf16[128,128], index: 5, kind: input, shape index: {}]   ;;  %s1142_s1 = inlined_call_operand.vmem [shape: f32[16,128], index: 1, kind: input, shape index: {}]   ;;  %s1143_s0 = inlined_call_operand.vmem [shape: f32[16,128], index: 0, kind: input, shape index: {}, may-alias: {0,6}]   ;;  %s1144_s2 = inlined_call_operand.vmem [shape: f32[16,128], index: 2, kind: input, shape index: {}]   ;;  %s1145_s4 = inlined_call_operand.vmem [shape: f32[20,128], index: 4, kind: input, shape index: {}]   ;;  %s1146_s6 = inlined_call_operand.vmem [shape: f32[16,128], index: 6, kind: output, shape index: {}, may-alias: {0,6}]  }
   0x1   :  { %v784_v0 = vld [vmem:[%s1140_s3 + $0x38] sm:$0xff]  ;;  %v790_v1 = vld [vmem:[%s1140_s3 + $0x30] sm:$0xff]  ;;  %v802_v3 = vld [vmem:[%s1140_s3 + $0x28] sm:$0xff] }
   0x2   :  { %118 = vmatpush.bf16.msra.mxu0 %v784_v0  ;;  %212 = vmatpush.bf16.msra.mxu2 %v784_v0  ;;  %v796_v2 = vld [vmem:[%s1141_s5 + $0x38] sm:$0xff]  ;;  %v808_v4 = vld [vmem:[%s1141_s5 + $0x30] sm:$0xff]  ;;  %v816_v5 = vld [vmem:[%s1140_s3 + $0x20] sm:$0xff] }
   0x3   :  { %183 = vmatpush.bf16.msra.mxu1 %v796_v2  ;;  %229 = vmatpush.bf16.msra.mxu3 %v796_v2  ;;  %v822_v6 = vld [vmem:[%s1141_s5 + $0x28] sm:$0xff]  ;;  %v830_v7 = vld [vmem:[%s1140_s3 + $0x18] sm:$0xff]  ;;  %v838_v8 = vld [vmem:[%s1140_s3 + $0x10] sm:$0xff] }
   0x4   :  { %v843_v9 = vld [vmem:[%s1142_s1] sm:$0xff]  ;;  %v849_v10 = vld [vmem:[%s1142_s1 + $0x8] sm:$0xff]  ;;  %v928_v23 = vld [vmem:[%s1141_s5 + $0x18] sm:$0xff] }
   0x5   :  { %v62_v11 = vld [vmem:[%s1143_s0] sm:$0xff]  ;;  %v63_v12 = vld [vmem:[%s1143_s0 + $0x8] sm:$0xff]  ;;  %v935_v24 = vld [vmem:[%s1141_s5 + $0x10] sm:$0xff] }
   0x6   :  { %119 = vmatpush.bf16.msra.mxu0 %v790_v1  ;;  %213 = vmatpush.bf16.msra.mxu2 %v790_v1  ;;  %v64_v13 = vmul.f32 %v62_v11, %v843_v9  ;;  %v65_v14 = vmul.f32 %v63_v12, %v849_v10  ;;  %v864_v15 = vld [vmem:[%s1140_s3 + $0x8] sm:$0xff]  ;;  %v869_v16 = vld [vmem:[%s1144_s2] sm:$0xff] }
   0x7   :  { %184 = vmatpush.bf16.msra.mxu1 %v808_v4  ;;  %230 = vmatpush.bf16.msra.mxu3 %v808_v4  ;;  %v874_v17 = vld [vmem:[%s1144_s2 + $0x8] sm:$0xff]  ;;  %v887_v20 = vld [vmem:[%s1140_s3] sm:$0xff] }
   0x8   :  { %v878_v18 = vadd.f32 %v64_v13, %v869_v16  ;;  %v881_v19 = vadd.f32 %v65_v14, %v874_v17  ;;  %v921_v22 = vld [vmem:[%s1141_s5 + $0x20] sm:$0xff]  ;;  %v942_v25 = vld [vmem:[%s1141_s5 + $0x8] sm:$0xff] }
   0x9   :  { %v948_v26 = vld [vmem:[%s1141_s5] sm:$0xff]  ;;  %v986_v36 = vld [vmem:[%s1145_s4 + $0x8] sm:$0xff] }
   0xa   :  { %120 = vmatpush.bf16.msra.mxu0 %v802_v3  ;;  %214 = vmatpush.bf16.msra.mxu2 %v802_v3  ;;  %v68_v21 = vpack.c.bf16 %v881_v19, %v878_v18  ;;  %v964_v27 = vld [vmem:[%s1145_s4] sm:$0xff]  ;;  %v199_v39 = vperm.slane %v986_v36, 2  ;;  %v202_v40 = vmul.f32 0.9647311, %v878_v18  ;;  %v203_v43 = vmul.f32 0.9647311, %v881_v19 }
   0xb   :  { %185 = vmatpush.bf16.msra.mxu1 %v822_v6  ;;  %231 = vmatpush.bf16.msra.mxu3 %v822_v6  ;;  %v69_v29 = vperm.slane %v964_v27, 0  ;;  %v211_v54 = vperm.slane %v964_v27, 1  ;;  %v245_v63 = vperm.slane %v986_v36, 3 }
   0xe   :  { %121 = vmatpush.bf16.msra.mxu0 %v816_v5  ;;  %215 = vmatpush.bf16.msra.mxu2 %v816_v5 }
   0xf   :  { %186 = vmatpush.bf16.msra.mxu1 %v921_v22  ;;  %232 = vmatpush.bf16.msra.mxu3 %v921_v22 }
  0x12   :  { %122 = vmatpush.bf16.msra.mxu0 %v830_v7  ;;  %216 = vmatpush.bf16.msra.mxu2 %v830_v7 }
  0x13   :  { %187 = vmatpush.bf16.msra.mxu1 %v928_v23  ;;  %233 = vmatpush.bf16.msra.mxu3 %v928_v23 }
  0x16   :  { %123 = vmatpush.bf16.msra.mxu0 %v838_v8  ;;  %217 = vmatpush.bf16.msra.mxu2 %v838_v8 }
  0x17   :  { %188 = vmatpush.bf16.msra.mxu1 %v935_v24  ;;  %234 = vmatpush.bf16.msra.mxu3 %v935_v24 }
  0x1a   :  { %124 = vmatpush.bf16.msra.mxu0 %v864_v15  ;;  %218 = vmatpush.bf16.msra.mxu2 %v864_v15 }
  0x1b   :  { %189 = vmatpush.bf16.msra.mxu1 %v942_v25  ;;  %235 = vmatpush.bf16.msra.mxu3 %v942_v25 }
  0x1e   :  { %125 = vmatpush.bf16.msra.mxu0 %v887_v20  ;;  %219 = vmatpush.bf16.msra.mxu2 %v887_v20 }
  0x1f   :  { %190 = vmatpush.bf16.msra.mxu1 %v948_v26  ;;  %236 = vmatpush.bf16.msra.mxu3 %v948_v26 }
  0x21   :  { %126 = vmatmul.bf16.vlgmr.msra.gmra.mxu0 %v68_v21 }
  0x22   :  { %258 = vmatpush.bf16.msrb.mxu0 %v784_v0  ;;  %304 = vmatpush.bf16.msrb.mxu2 %v784_v0 }
  0x23   :  { %275 = vmatpush.bf16.msrb.mxu1 %v796_v2  ;;  %321 = vmatpush.bf16.msrb.mxu3 %v796_v2 }
  0x26   :  { %259 = vmatpush.bf16.msrb.mxu0 %v790_v1  ;;  %305 = vmatpush.bf16.msrb.mxu2 %v790_v1 }
  0x27   :  { %276 = vmatpush.bf16.msrb.mxu1 %v808_v4  ;;  %322 = vmatpush.bf16.msrb.mxu3 %v808_v4 }
  0x2a   :  { %260 = vmatpush.bf16.msrb.mxu0 %v802_v3  ;;  %306 = vmatpush.bf16.msrb.mxu2 %v802_v3 }
  0x2b   :  { %277 = vmatpush.bf16.msrb.mxu1 %v822_v6  ;;  %323 = vmatpush.bf16.msrb.mxu3 %v822_v6 }
  0x2e   :  { %261 = vmatpush.bf16.msrb.mxu0 %v816_v5  ;;  %307 = vmatpush.bf16.msrb.mxu2 %v816_v5 }
  0x2f   :  { %278 = vmatpush.bf16.msrb.mxu1 %v921_v22  ;;  %324 = vmatpush.bf16.msrb.mxu3 %v921_v22 }
  0x32   :  { %262 = vmatpush.bf16.msrb.mxu0 %v830_v7  ;;  %308 = vmatpush.bf16.msrb.mxu2 %v830_v7 }
  0x33   :  { %279 = vmatpush.bf16.msrb.mxu1 %v928_v23  ;;  %325 = vmatpush.bf16.msrb.mxu3 %v928_v23 }
  0x36   :  { %263 = vmatpush.bf16.msrb.mxu0 %v838_v8  ;;  %309 = vmatpush.bf16.msrb.mxu2 %v838_v8 }
  0x37   :  { %280 = vmatpush.bf16.msrb.mxu1 %v935_v24  ;;  %326 = vmatpush.bf16.msrb.mxu3 %v935_v24 }
  0x3a   :  { %264 = vmatpush.bf16.msrb.mxu0 %v864_v15  ;;  %310 = vmatpush.bf16.msrb.mxu2 %v864_v15 }
  0x3b   :  { %281 = vmatpush.bf16.msrb.mxu1 %v942_v25  ;;  %327 = vmatpush.bf16.msrb.mxu3 %v942_v25 }
  0x3e   :  { %265 = vmatpush.bf16.msrb.mxu0 %v887_v20  ;;  %311 = vmatpush.bf16.msrb.mxu2 %v887_v20 }
  0x3f   :  { %282 = vmatpush.bf16.msrb.mxu1 %v948_v26  ;;  %328 = vmatpush.bf16.msrb.mxu3 %v948_v26 }
  0x42   :  { %350 = vmatpush.bf16.msra.mxu0 %v784_v0 }
  0x46   :  { %351 = vmatpush.bf16.msra.mxu0 %v790_v1 }
  0x4a   :  { %352 = vmatpush.bf16.msra.mxu0 %v802_v3 }
  0x4e   :  { %353 = vmatpush.bf16.msra.mxu0 %v816_v5 }
  0x52   :  { %354 = vmatpush.bf16.msra.mxu0 %v830_v7 }
  0x56   :  { %355 = vmatpush.bf16.msra.mxu0 %v838_v8 }
  0x5a   :  { %356 = vmatpush.bf16.msra.mxu0 %v864_v15 }
  0x5e   :  { %357 = vmatpush.bf16.msra.mxu0 %v887_v20 }
  0x9e   :  { %v127_v28 = vpop.f32.mrf.mxu0 }
  0x9f   :  { %v128_v30 = vadd.f32 %v127_v28, %v69_v29 }
  0xa1   :  { %706 = vtanh.f32 %v128_v30 }
  0xa6   :  { %v129_v31 = vpop.f32.mrf.mxu0 }
  0xa7   :  { %v130_v32 = vadd.f32 %v129_v31, %v69_v29  ;;  %v707_v33 = vpop.eup %706 }
  0xa9   :  { %708 = vtanh.f32 %v130_v32 }
  0xaf   :  { %v709_v34 = vpop.eup %708 }
  0xb0   :  { %v134_v35 = vpack.c.bf16 %v709_v34, %v707_v33 }
  0xb2   :  { %191 = vmatmul.bf16.vlgmr.msra.gmra.mxu1 %v134_v35  ;;  %v257_v35 = vperm.slane %v964_v27, 2 }
  0xb3   :  { %367 = vmatpush.bf16.msra.mxu1 %v796_v2 }
  0xb7   :  { %368 = vmatpush.bf16.msra.mxu1 %v808_v4 }
  0xbb   :  { %369 = vmatpush.bf16.msra.mxu1 %v822_v6 }
  0xbf   :  { %370 = vmatpush.bf16.msra.mxu1 %v921_v22 }
  0xc3   :  { %371 = vmatpush.bf16.msra.mxu1 %v928_v23 }
  0xc7   :  { %372 = vmatpush.bf16.msra.mxu1 %v935_v24 }
  0xcb   :  { %373 = vmatpush.bf16.msra.mxu1 %v942_v25 }
  0xcf   :  { %374 = vmatpush.bf16.msra.mxu1 %v948_v26 }
 0x12f   :  { %v192_v37 = vpop.f32.mrf.mxu1 }
 0x130   :  { %v197_v38 = vmul.f32 0.15693247, %v192_v37 }
 0x132   :  { %v200_v41 = vadd.f32 %v199_v39, %v197_v38 }
 0x134   :  { %v204_v44 = vadd.f32 %v202_v40, %v200_v41 }
 0x136   :  { %v206_v48 = vmul.f32 %v204_v44, %v843_v9 }
 0x137   :  { %v194_v42 = vpop.f32.mrf.mxu1 }
 0x138   :  { %v198_v45 = vmul.f32 0.15693247, %v194_v42  ;;  %v208_v50 = vadd.f32 %v206_v48, %v869_v16 }
 0x13a   :  { %v201_v46 = vadd.f32 %v199_v39, %v198_v45  ;;  %v248_v12 = vmul.f32 0.9392023, %v208_v50  ;;  %v291_v45 = vperm.slane %v986_v36, 4 }
 0x13c   :  { %v205_v47 = vadd.f32 %v203_v43, %v201_v46 }
 0x13e   :  { %v207_v49 = vmul.f32 %v205_v47, %v849_v10 }
 0x140   :  { %v209_v51 = vadd.f32 %v207_v49, %v874_v17 }
 0x142   :  { %v210_v52 = vpack.c.bf16 %v209_v51, %v208_v50  ;;  %v249_v19 = vmul.f32 0.9392023, %v209_v51 }
 0x144   :  { %220 = vmatmul.bf16.vlgmr.msra.gmra.mxu2 %v210_v52 }
 0x145   :  { %396 = vmatpush.bf16.msra.mxu2 %v784_v0 }
 0x149   :  { %397 = vmatpush.bf16.msra.mxu2 %v790_v1 }
 0x14d   :  { %398 = vmatpush.bf16.msra.mxu2 %v802_v3 }
 0x151   :  { %399 = vmatpush.bf16.msra.mxu2 %v816_v5 }
 0x155   :  { %400 = vmatpush.bf16.msra.mxu2 %v830_v7 }
 0x159   :  { %401 = vmatpush.bf16.msra.mxu2 %v838_v8 }
 0x15d   :  { %402 = vmatpush.bf16.msra.mxu2 %v864_v15 }
 0x161   :  { %403 = vmatpush.bf16.msra.mxu2 %v887_v20 }
 0x1c7   :  { %v221_v53 = vpop.f32.mrf.mxu2 }
 0x1c8   :  { %v222_v55 = vadd.f32 %v221_v53, %v211_v54 }
 0x1ca   :  { %710 = vtanh.f32 %v222_v55 }
 0x1cf   :  { %v223_v56 = vpop.f32.mrf.mxu2 }
 0x1d0   :  { %v224_v57 = vadd.f32 %v223_v56, %v211_v54  ;;  %v711_v58 = vpop.eup %710 }
 0x1d2   :  { %712 = vtanh.f32 %v224_v57 }
 0x1d8   :  { %v713_v59 = vpop.eup %712 }
 0x1d9   :  { %v228_v60 = vpack.c.bf16 %v713_v59, %v711_v58 }
 0x1db   :  { %237 = vmatmul.bf16.vlgmr.msra.gmra.mxu3 %v228_v60  ;;  %v303_v60 = vperm.slane %v964_v27, 3 }
 0x1dc   :  { %413 = vmatpush.bf16.msra.mxu3 %v796_v2 }
 0x1e0   :  { %414 = vmatpush.bf16.msra.mxu3 %v808_v4 }
 0x1e4   :  { %415 = vmatpush.bf16.msra.mxu3 %v822_v6 }
 0x1e8   :  { %416 = vmatpush.bf16.msra.mxu3 %v921_v22 }
 0x1ec   :  { %417 = vmatpush.bf16.msra.mxu3 %v928_v23 }
 0x1f0   :  { %418 = vmatpush.bf16.msra.mxu3 %v935_v24 }
 0x1f4   :  { %419 = vmatpush.bf16.msra.mxu3 %v942_v25 }
 0x1f8   :  { %420 = vmatpush.bf16.msra.mxu3 %v948_v26 }
 0x25e   :  { %v238_v61 = vpop.f32.mrf.mxu3 }
 0x25f   :  { %v243_v62 = vmul.f32 0.16267101, %v238_v61 }
 0x261   :  { %v246_v11 = vadd.f32 %v245_v63, %v243_v62 }
 0x263   :  { %v250_v14 = vadd.f32 %v248_v12, %v246_v11 }
 0x265   :  { %v252_v28 = vmul.f32 %v250_v14, %v843_v9 }
 0x266   :  { %v240_v13 = vpop.f32.mrf.mxu3 }
 0x267   :  { %v244_v18 = vmul.f32 0.16267101, %v240_v13  ;;  %v254_v31 = vadd.f32 %v252_v28, %v869_v16 }
 0x269   :  { %v247_v21 = vadd.f32 %v245_v63, %v244_v18  ;;  %v294_v47 = vmul.f32 0.91102594, %v254_v31 }
 0x26b   :  { %v251_v29 = vadd.f32 %v249_v19, %v247_v21  ;;  %v337_v19 = vperm.slane %v986_v36, 5 }
 0x26d   :  { %v253_v30 = vmul.f32 %v251_v29, %v849_v10 }
 0x26f   :  { %v255_v32 = vadd.f32 %v253_v30, %v874_v17 }
 0x271   :  { %v256_v33 = vpack.c.bf16 %v255_v32, %v254_v31  ;;  %v295_v52 = vmul.f32 0.91102594, %v255_v32 }
 0x273   :  { %266 = vmatmul.bf16.vlgmr.msrb.gmra.mxu0 %v256_v33 }
 0x274   :  { %442 = vmatpush.bf16.msrb.mxu0 %v784_v0 }
 0x278   :  { %443 = vmatpush.bf16.msrb.mxu0 %v790_v1 }
 0x27c   :  { %444 = vmatpush.bf16.msrb.mxu0 %v802_v3 }
 0x280   :  { %445 = vmatpush.bf16.msrb.mxu0 %v816_v5 }
 0x284   :  { %446 = vmatpush.bf16.msrb.mxu0 %v830_v7 }
 0x288   :  { %447 = vmatpush.bf16.msrb.mxu0 %v838_v8 }
 0x28c   :  { %448 = vmatpush.bf16.msrb.mxu0 %v864_v15 }
 0x290   :  { %449 = vmatpush.bf16.msrb.mxu0 %v887_v20 }
 0x2f0   :  { %v267_v34 = vpop.f32.mrf.mxu0 }
 0x2f1   :  { %v268_v37 = vadd.f32 %v267_v34, %v257_v35 }
 0x2f3   :  { %714 = vtanh.f32 %v268_v37 }
 0x2f8   :  { %v269_v38 = vpop.f32.mrf.mxu0 }
 0x2f9   :  { %v270_v39 = vadd.f32 %v269_v38, %v257_v35  ;;  %v715_v40 = vpop.eup %714 }
 0x2fb   :  { %716 = vtanh.f32 %v270_v39 }
 0x301   :  { %v717_v41 = vpop.eup %716 }
 0x302   :  { %v274_v42 = vpack.c.bf16 %v717_v41, %v715_v40 }
 0x304   :  { %283 = vmatmul.bf16.vlgmr.msrb.gmra.mxu1 %v274_v42  ;;  %v349_v42 = vperm.slane %v964_v27, 4 }
 0x305   :  { %459 = vmatpush.bf16.msrb.mxu1 %v796_v2 }
 0x309   :  { %460 = vmatpush.bf16.msrb.mxu1 %v808_v4 }
 0x30d   :  { %461 = vmatpush.bf16.msrb.mxu1 %v822_v6 }
 0x311   :  { %462 = vmatpush.bf16.msrb.mxu1 %v921_v22 }
 0x315   :  { %463 = vmatpush.bf16.msrb.mxu1 %v928_v23 }
 0x319   :  { %464 = vmatpush.bf16.msrb.mxu1 %v935_v24 }
 0x31d   :  { %465 = vmatpush.bf16.msrb.mxu1 %v942_v25 }
 0x321   :  { %466 = vmatpush.bf16.msrb.mxu1 %v948_v26 }
 0x381   :  { %v284_v43 = vpop.f32.mrf.mxu1 }
 0x382   :  { %v289_v44 = vmul.f32 0.17320387, %v284_v43 }
 0x384   :  { %v292_v46 = vadd.f32 %v291_v45, %v289_v44 }
 0x386   :  { %v296_v49 = vadd.f32 %v294_v47, %v292_v46 }
 0x388   :  { %v298_v53 = vmul.f32 %v296_v49, %v843_v9 }
 0x389   :  { %v286_v48 = vpop.f32.mrf.mxu1 }
 0x38a   :  { %v290_v50 = vmul.f32 0.17320387, %v286_v48  ;;  %v300_v56 = vadd.f32 %v298_v53, %v869_v16 }
 0x38c   :  { %v293_v51 = vadd.f32 %v291_v45, %v290_v50  ;;  %v340_v28 = vmul.f32 0.878093, %v300_v56 }
 0x38e   :  { %v297_v54 = vadd.f32 %v295_v52, %v293_v51  ;;  %v383_v51 = vperm.slane %v986_v36, 6 }
 0x390   :  { %v299_v55 = vmul.f32 %v297_v54, %v849_v10 }
 0x392   :  { %v301_v57 = vadd.f32 %v299_v55, %v874_v17 }
 0x394   :  { %v302_v58 = vpack.c.bf16 %v301_v57, %v300_v56  ;;  %v341_v33 = vmul.f32 0.878093, %v301_v57 }
 0x396   :  { %312 = vmatmul.bf16.vlgmr.msrb.gmra.mxu2 %v302_v58 }
 0x397   :  { %488 = vmatpush.bf16.msrb.mxu2 %v784_v0 }
 0x39b   :  { %489 = vmatpush.bf16.msrb.mxu2 %v790_v1 }
 0x39f   :  { %490 = vmatpush.bf16.msrb.mxu2 %v802_v3 }
 0x3a3   :  { %491 = vmatpush.bf16.msrb.mxu2 %v816_v5 }
 0x3a7   :  { %492 = vmatpush.bf16.msrb.mxu2 %v830_v7 }
 0x3ab   :  { %493 = vmatpush.bf16.msrb.mxu2 %v838_v8 }
 0x3af   :  { %494 = vmatpush.bf16.msrb.mxu2 %v864_v15 }
 0x3b3   :  { %495 = vmatpush.bf16.msrb.mxu2 %v887_v20 }
 0x419   :  { %v313_v59 = vpop.f32.mrf.mxu2 }
 0x41a   :  { %v314_v61 = vadd.f32 %v313_v59, %v303_v60 }
 0x41c   :  { %718 = vtanh.f32 %v314_v61 }
 0x421   :  { %v315_v62 = vpop.f32.mrf.mxu2 }
 0x422   :  { %v316_v63 = vadd.f32 %v315_v62, %v303_v60  ;;  %v719_v11 = vpop.eup %718 }
 0x424   :  { %720 = vtanh.f32 %v316_v63 }
 0x42a   :  { %v721_v12 = vpop.eup %720 }
 0x42b   :  { %v320_v13 = vpack.c.bf16 %v721_v12, %v719_v11 }
 0x42d   :  { %329 = vmatmul.bf16.vlgmr.msrb.gmra.mxu3 %v320_v13  ;;  %v395_v13 = vperm.slane %v964_v27, 5 }
 0x42e   :  { %505 = vmatpush.bf16.msrb.mxu3 %v796_v2 }
 0x432   :  { %506 = vmatpush.bf16.msrb.mxu3 %v808_v4 }
 0x436   :  { %507 = vmatpush.bf16.msrb.mxu3 %v822_v6 }
 0x43a   :  { %508 = vmatpush.bf16.msrb.mxu3 %v921_v22 }
 0x43e   :  { %509 = vmatpush.bf16.msrb.mxu3 %v928_v23 }
 0x442   :  { %510 = vmatpush.bf16.msrb.mxu3 %v935_v24 }
 0x446   :  { %511 = vmatpush.bf16.msrb.mxu3 %v942_v25 }
 0x44a   :  { %512 = vmatpush.bf16.msrb.mxu3 %v948_v26 }
 0x4b0   :  { %v330_v14 = vpop.f32.mrf.mxu3 }
 0x4b1   :  { %v335_v18 = vmul.f32 0.19012457, %v330_v14 }
 0x4b3   :  { %v338_v21 = vadd.f32 %v337_v19, %v335_v18 }
 0x4b5   :  { %v342_v30 = vadd.f32 %v340_v28, %v338_v21 }
 0x4b7   :  { %v344_v34 = vmul.f32 %v342_v30, %v843_v9 }
 0x4b8   :  { %v332_v29 = vpop.f32.mrf.mxu3 }
 0x4b9   :  { %v336_v31 = vmul.f32 0.19012457, %v332_v29  ;;  %v346_v38 = vadd.f32 %v344_v34, %v869_v16 }
 0x4bb   :  { %v339_v32 = vadd.f32 %v337_v19, %v336_v31  ;;  %v386_v53 = vmul.f32 0.83691895, %v346_v38  ;;  %v441_v31 = vperm.slane %v964_v27, 6 }
 0x4bd   :  { %v343_v35 = vadd.f32 %v341_v33, %v339_v32 }
 0x4bf   :  { %v345_v37 = vmul.f32 %v343_v35, %v849_v10 }
 0x4c1   :  { %v347_v39 = vadd.f32 %v345_v37, %v874_v17 }
 0x4c3   :  { %v348_v40 = vpack.c.bf16 %v347_v39, %v346_v38  ;;  %v387_v58 = vmul.f32 0.83691895, %v347_v39  ;;  %v1109_v39 = vld [vmem:[%s1145_s4 + $0x10] sm:$0xf] }
 0x4c5   :  { %358 = vmatmul.bf16.vlgmr.msra.gmra.mxu0 %v348_v40 }
 0x4c6   :  { %534 = vmatpush.bf16.msra.mxu0 %v784_v0 }
 0x4ca   :  { %535 = vmatpush.bf16.msra.mxu0 %v790_v1 }
 0x4ce   :  { %536 = vmatpush.bf16.msra.mxu0 %v802_v3 }
 0x4d2   :  { %537 = vmatpush.bf16.msra.mxu0 %v816_v5 }
 0x4d6   :  { %538 = vmatpush.bf16.msra.mxu0 %v830_v7 }
 0x4da   :  { %539 = vmatpush.bf16.msra.mxu0 %v838_v8 }
 0x4de   :  { %540 = vmatpush.bf16.msra.mxu0 %v864_v15 }
 0x4e2   :  { %541 = vmatpush.bf16.msra.mxu0 %v887_v20 }
 0x542   :  { %v359_v41 = vpop.f32.mrf.mxu0 }
 0x543   :  { %v360_v43 = vadd.f32 %v359_v41, %v349_v42 }
 0x545   :  { %722 = vtanh.f32 %v360_v43 }
 0x54a   :  { %v361_v44 = vpop.f32.mrf.mxu0 }
 0x54b   :  { %v362_v45 = vadd.f32 %v361_v44, %v349_v42  ;;  %v723_v46 = vpop.eup %722  ;;  %v475_v42 = vperm.slane %v1109_v39, 0 }
 0x54d   :  { %724 = vtanh.f32 %v362_v45 }
 0x553   :  { %v725_v47 = vpop.eup %724 }
 0x554   :  { %v366_v48 = vpack.c.bf16 %v725_v47, %v723_v46 }
 0x556   :  { %375 = vmatmul.bf16.vlgmr.msra.gmra.mxu1 %v366_v48 }
 0x557   :  { %551 = vmatpush.bf16.msra.mxu1 %v796_v2 }
 0x55b   :  { %552 = vmatpush.bf16.msra.mxu1 %v808_v4 }
 0x55f   :  { %553 = vmatpush.bf16.msra.mxu1 %v822_v6 }
 0x563   :  { %554 = vmatpush.bf16.msra.mxu1 %v921_v22 }
 0x567   :  { %555 = vmatpush.bf16.msra.mxu1 %v928_v23 }
 0x56b   :  { %556 = vmatpush.bf16.msra.mxu1 %v935_v24 }
 0x56f   :  { %557 = vmatpush.bf16.msra.mxu1 %v942_v25 }
 0x573   :  { %558 = vmatpush.bf16.msra.mxu1 %v948_v26 }
 0x5d3   :  { %v376_v49 = vpop.f32.mrf.mxu1 }
 0x5d4   :  { %v381_v50 = vmul.f32 0.2165301, %v376_v49 }
 0x5d6   :  { %v384_v52 = vadd.f32 %v383_v51, %v381_v50 }
 0x5d8   :  { %v388_v55 = vadd.f32 %v386_v53, %v384_v52 }
 0x5da   :  { %v390_v59 = vmul.f32 %v388_v55, %v843_v9 }
 0x5db   :  { %v378_v54 = vpop.f32.mrf.mxu1 }
 0x5dc   :  { %v382_v56 = vmul.f32 0.2165301, %v378_v54  ;;  %v392_v62 = vadd.f32 %v390_v59, %v869_v16 }
 0x5de   :  { %v385_v57 = vadd.f32 %v383_v51, %v382_v56 }
 0x5e0   :  { %v389_v60 = vadd.f32 %v387_v58, %v385_v57  ;;  %v487_v57 = vperm.slane %v964_v27, 7 }
 0x5e2   :  { %v391_v61 = vmul.f32 %v389_v60, %v849_v10 }
 0x5e4   :  { %v393_v63 = vadd.f32 %v391_v61, %v874_v17 }
 0x5e6   :  { %v394_v11 = vpack.c.bf16 %v393_v63, %v392_v62  ;;  %v433_v28 = vmul.f32 0.7808758, %v393_v63 }
 0x5e8   :  { %404 = vmatmul.bf16.vlgmr.msra.gmra.mxu2 %v394_v11 }
 0x5e9   :  { %580 = vmatpush.bf16.msra.mxu2 %v784_v0 }
 0x5ed   :  { %581 = vmatpush.bf16.msra.mxu2 %v790_v1 }
 0x5f1   :  { %582 = vmatpush.bf16.msra.mxu2 %v802_v3 }
 0x5f5   :  { %583 = vmatpush.bf16.msra.mxu2 %v816_v5 }
 0x5f9   :  { %584 = vmatpush.bf16.msra.mxu2 %v830_v7 }
 0x5fd   :  { %585 = vmatpush.bf16.msra.mxu2 %v838_v8  ;;  %v429_v8 = vperm.slane %v986_v36, 7 }
 0x601   :  { %586 = vmatpush.bf16.msra.mxu2 %v864_v15 }
 0x605   :  { %587 = vmatpush.bf16.msra.mxu2 %v887_v20 }
 0x66b   :  { %v405_v12 = vpop.f32.mrf.mxu2 }
 0x66c   :  { %v406_v14 = vadd.f32 %v405_v12, %v395_v13 }
 0x66e   :  { %726 = vtanh.f32 %v406_v14 }
 0x673   :  { %v407_v18 = vpop.f32.mrf.mxu2 }
 0x674   :  { %v408_v0 = vadd.f32 %v407_v18, %v395_v13  ;;  %v727_v1 = vpop.eup %726  ;;  %v521_v13 = vperm.slane %v1109_v39, 1 }
 0x676   :  { %728 = vtanh.f32 %v408_v0 }
 0x67c   :  { %v729_v3 = vpop.eup %728 }
 0x67d   :  { %v412_v19 = vpack.c.bf16 %v729_v3, %v727_v1 }
 0x67f   :  { %421 = vmatmul.bf16.vlgmr.msra.gmra.mxu3 %v412_v19 }
 0x680   :  { %598 = vmatpush.bf16.msra.mxu3 %v796_v2  ;;  %v432_v2 = vmul.f32 0.7808758, %v392_v62 }
 0x684   :  { %599 = vmatpush.bf16.msra.mxu3 %v808_v4 }
 0x688   :  { %600 = vmatpush.bf16.msra.mxu3 %v822_v6 }
 0x68c   :  { %601 = vmatpush.bf16.msra.mxu3 %v921_v22 }
 0x690   :  { %602 = vmatpush.bf16.msra.mxu3 %v928_v23 }
 0x694   :  { %603 = vmatpush.bf16.msra.mxu3 %v935_v24 }
 0x698   :  { %604 = vmatpush.bf16.msra.mxu3 %v942_v25 }
 0x69c   :  { %605 = vmatpush.bf16.msra.mxu3 %v948_v26 }
 0x702   :  { %v422_v5 = vpop.f32.mrf.mxu3 }
 0x703   :  { %v427_v7 = vmul.f32 0.25874737, %v422_v5 }
 0x705   :  { %v430_v15 = vadd.f32 %v429_v8, %v427_v7 }
 0x707   :  { %v434_v4 = vadd.f32 %v432_v2, %v430_v15 }
 0x709   :  { %v436_v22 = vmul.f32 %v434_v4, %v843_v9 }
 0x70a   :  { %v424_v20 = vpop.f32.mrf.mxu3 }
 0x70b   :  { %v428_v21 = vmul.f32 0.25874737, %v424_v20  ;;  %v438_v25 = vadd.f32 %v436_v22, %v869_v16 }
 0x70d   :  { %v431_v6 = vadd.f32 %v429_v8, %v428_v21  ;;  %v478_v44 = vmul.f32 0.69506556, %v438_v25  ;;  %v533_v21 = vperm.slane %v986_v36, 0 }
 0x70f   :  { %v435_v23 = vadd.f32 %v433_v28, %v431_v6 }
 0x711   :  { %v437_v24 = vmul.f32 %v435_v23, %v849_v10 }
 0x713   :  { %v439_v26 = vadd.f32 %v437_v24, %v874_v17 }
 0x715   :  { %v440_v29 = vpack.c.bf16 %v439_v26, %v438_v25  ;;  %v479_v49 = vmul.f32 0.69506556, %v439_v26 }
 0x717   :  { %450 = vmatmul.bf16.vlgmr.msrb.gmra.mxu0 %v440_v29 }
 0x794   :  { %v451_v30 = vpop.f32.mrf.mxu0 }
 0x795   :  { %v452_v32 = vadd.f32 %v451_v30, %v441_v31  ;;  %v567_v30 = vperm.slane %v1109_v39, 2 }
 0x797   :  { %730 = vtanh.f32 %v452_v32 }
 0x79c   :  { %v453_v33 = vpop.f32.mrf.mxu0 }
 0x79d   :  { %v454_v34 = vadd.f32 %v453_v33, %v441_v31  ;;  %v731_v35 = vpop.eup %730 }
 0x79f   :  { %732 = vtanh.f32 %v454_v34 }
 0x7a5   :  { %v733_v37 = vpop.eup %732 }
 0x7a6   :  { %v458_v38 = vpack.c.bf16 %v733_v37, %v731_v35 }
 0x7a8   :  { %467 = vmatmul.bf16.vlgmr.msrb.gmra.mxu1 %v458_v38 }
 0x825   :  { %v468_v40 = vpop.f32.mrf.mxu1 }
 0x826   :  { %v473_v41 = vmul.f32 0.33143154, %v468_v40 }
 0x828   :  { %v476_v43 = vadd.f32 %v475_v42, %v473_v41 }
 0x82a   :  { %v480_v46 = vadd.f32 %v478_v44, %v476_v43 }
 0x82c   :  { %v482_v50 = vmul.f32 %v480_v46, %v843_v9 }
 0x82d   :  { %v470_v45 = vpop.f32.mrf.mxu1 }
 0x82e   :  { %v474_v47 = vmul.f32 0.33143154, %v470_v45  ;;  %v484_v53 = vadd.f32 %v482_v50, %v869_v16 }
 0x830   :  { %v477_v48 = vadd.f32 %v475_v42, %v474_v47  ;;  %v524_v18 = vmul.f32 0.5366261, %v484_v53  ;;  %v579_v47 = vperm.slane %v986_v36, 1 }
 0x832   :  { %v481_v51 = vadd.f32 %v479_v49, %v477_v48 }
 0x834   :  { %v483_v52 = vmul.f32 %v481_v51, %v849_v10 }
 0x836   :  { %v485_v54 = vadd.f32 %v483_v52, %v874_v17 }
 0x838   :  { %v486_v55 = vpack.c.bf16 %v485_v54, %v484_v53  ;;  %v525_v27 = vmul.f32 0.5366261, %v485_v54  ;;  %v597_v54 = vperm.slane %v1109_v39, 3 }
 0x83a   :  { %496 = vmatmul.bf16.vlgmr.msrb.gmra.mxu2 %v486_v55 }
 0x8bd   :  { %v497_v56 = vpop.f32.mrf.mxu2 }
 0x8be   :  { %v498_v58 = vadd.f32 %v497_v56, %v487_v57 }
 0x8c0   :  { %734 = vtanh.f32 %v498_v58 }
 0x8c5   :  { %v499_v59 = vpop.f32.mrf.mxu2 }
 0x8c6   :  { %v500_v60 = vadd.f32 %v499_v59, %v487_v57  ;;  %v735_v61 = vpop.eup %734 }
 0x8c8   :  { %736 = vtanh.f32 %v500_v60 }
 0x8ce   :  { %v737_v62 = vpop.eup %736 }
 0x8cf   :  { %v504_v63 = vpack.c.bf16 %v737_v62, %v735_v61 }
 0x8d1   :  { %513 = vmatmul.bf16.vlgmr.msrb.gmra.mxu3 %v504_v63 }
 0x954   :  { %v514_v11 = vpop.f32.mrf.mxu3 }
 0x955   :  { %v519_v12 = vmul.f32 0.47723755, %v514_v11 }
 0x957   :  { %v522_v14 = vadd.f32 %v521_v13, %v519_v12 }
 0x959   :  { %v526_v1 = vadd.f32 %v524_v18, %v522_v14 }
 0x95b   :  { %v528_v5 = vmul.f32 %v526_v1, %v843_v9 }
 0x95c   :  { %v516_v0 = vpop.f32.mrf.mxu3 }
 0x95d   :  { %v520_v3 = vmul.f32 0.47723755, %v516_v0  ;;  %v530_v15 = vadd.f32 %v528_v5, %v869_v16 }
 0x95f   :  { %v523_v19 = vadd.f32 %v521_v13, %v520_v3  ;;  %v570_v32 = vmul.f32 0.09137438, %v530_v15 }
 0x961   :  { %v527_v7 = vadd.f32 %v525_v27, %v523_v19 }
 0x963   :  { %v529_v8 = vmul.f32 %v527_v7, %v849_v10 }
 0x965   :  { %v531_v2 = vadd.f32 %v529_v8, %v874_v17 }
 0x967   :  { %v532_v20 = vpack.c.bf16 %v531_v2, %v530_v15  ;;  %v571_v38 = vmul.f32 0.09137438, %v531_v2 }
 0x969   :  { %542 = vmatmul.bf16.vlgmr.msra.gmra.mxu0 %v532_v20 }
 0x9e6   :  { %v543_v4 = vpop.f32.mrf.mxu0 }
 0x9e7   :  { %v544_v6 = vadd.f32 %v543_v4, %v533_v21 }
 0x9e9   :  { %738 = vtanh.f32 %v544_v6 }
 0x9ee   :  { %v545_v28 = vpop.f32.mrf.mxu0 }
 0x9ef   :  { %v546_v22 = vadd.f32 %v545_v28, %v533_v21  ;;  %v739_v23 = vpop.eup %738 }
 0x9f1   :  { %740 = vtanh.f32 %v546_v22 }
 0x9f7   :  { %v741_v24 = vpop.eup %740 }
 0x9f8   :  { %v550_v25 = vpack.c.bf16 %v741_v24, %v739_v23 }
 0x9fa   :  { %559 = vmatmul.bf16.vlgmr.msra.gmra.mxu1 %v550_v25 }
 0xa77   :  { %v560_v26 = vpop.f32.mrf.mxu1 }
 0xa78   :  { %v565_v29 = vmul.f32 0.9099041, %v560_v26 }
 0xa7a   :  { %v568_v31 = vadd.f32 %v567_v30, %v565_v29 }
 0xa7c   :  { %v572_v34 = vadd.f32 %v570_v32, %v568_v31 }
 0xa7e   :  { %v574_v40 = vmul.f32 %v572_v34, %v843_v9 }
 0xa7f   :  { %v562_v33 = vpop.f32.mrf.mxu1 }
 0xa80   :  { %v566_v35 = vmul.f32 0.9099041, %v562_v33  ;;  %v576_v43 = vadd.f32 %v574_v40, %v869_v16 }
 0xa82   :  { %v569_v37 = vadd.f32 %v567_v30, %v566_v35  ;;  %v612_v57 = vmul.f32 0.0, %v576_v43 }
 0xa84   :  { %v573_v41 = vadd.f32 %v571_v38, %v569_v37 }
 0xa86   :  { %v575_v42 = vmul.f32 %v573_v41, %v849_v10 }
 0xa88   :  { %v577_v44 = vadd.f32 %v575_v42, %v874_v17 }
 0xa8a   :  { %v578_v45 = vpack.c.bf16 %v577_v44, %v576_v43  ;;  %v613_v62 = vmul.f32 0.0, %v577_v44 }
 0xa8c   :  { %588 = vmatmul.bf16.vlgmr.msra.gmra.mxu2 %v578_v45 }
 0xb0f   :  { %v589_v46 = vpop.f32.mrf.mxu2 }
 0xb10   :  { %v590_v48 = vadd.f32 %v589_v46, %v579_v47 }
 0xb12   :  { %742 = vtanh.f32 %v590_v48 }
 0xb17   :  { %v591_v49 = vpop.f32.mrf.mxu2 }
 0xb18   :  { %v592_v50 = vadd.f32 %v591_v49, %v579_v47  ;;  %v743_v51 = vpop.eup %742 }
 0xb1a   :  { %744 = vtanh.f32 %v592_v50 }
 0xb20   :  { %v745_v52 = vpop.eup %744 }
 0xb21   :  { %v596_v53 = vpack.c.bf16 %v745_v52, %v743_v51 }
 0xb23   :  { %606 = vmatmul.bf16.vlgmr.msra.gmra.mxu3 %v596_v53 }
 0xba6   :  { %v607_v55 = vpop.f32.mrf.mxu3 }
 0xba7   :  { %v608_v56 = vadd.f32 %v607_v55, %v597_v54 }
 0xba9   :  { %v614_v58 = vadd.f32 %v612_v57, %v608_v56 }
 0xbab   :  { %v616_v59 = vmul.f32 %v614_v58, %v843_v9 }
 0xbad   :  { %v618_v60 = vadd.f32 %v616_v59, %v869_v16 }
 0xbae   :  { %v609_v36 = vpop.f32.mrf.mxu3 }
 0xbaf   :  { %620 = vst [vmem:[%s1146_s6] sm:$0xff] %v618_v60  ;;  %v610_v61 = vadd.f32 %v609_v36, %v597_v54 }
 0xbb1   :  { %v615_v63 = vadd.f32 %v613_v62, %v610_v61 }
 0xbb3   :  { %v617_v11 = vmul.f32 %v615_v63, %v849_v10 }
 0xbb5   :  { %v619_v39 = vadd.f32 %v617_v11, %v874_v17 }
 0xbb7   :  { %621 = vst [vmem:[%s1146_s6 + $0x8] sm:$0xff] %v619_v39 }

</bundles_post_ra>
